<compile_context>
chip_gen: v7x
topology: tpu7x:2x2x1
jax: 0.10.0
libtpu: 0.0.40
codegen_flags: <defaults>
</compile_context>

<pallas_src>
import functools

import jax
import jax.numpy as jnp
from jax import lax
from jax.experimental import pallas as pl
from jax.experimental.pallas import tpu as pltpu

_LANES = 128
_SUBLANES = 8


def _round_up(x, m):
    return (x + m - 1) // m * m


def _num_tensorcores():
    """v7x packs 2 TensorCores per chip; v5e/v6e have 1 (default)."""
    try:
        kind = jax.devices()[0].device_kind.lower()
    except Exception:
        kind = ""
    return 2 if "v7" in kind else 1


def _mdn_fused_kernel(x_ref, w_ref, b_ref, out_ref, *, n_mu, n_alpha):
    """x:(tb,in_dim)  w:(in_dim,n_pad)  b:(1,n_pad)  out:(tb,n_pad).

    Lane layout of the fused output:
      [0, n_mu)               -> mu
      [n_mu, 2*n_mu)          -> sigma (exp + clamp)
      [2*n_mu, 2*n_mu+n_al)   -> alpha (masked softmax)
      [2*n_mu+n_al, n_pad)    -> zero padding
    """
    # Single fused matmul on the MXU; native dtype in, f32 accumulation.
    y = jnp.dot(x_ref[...], w_ref[...], preferred_element_type=jnp.float32)
    y = y + b_ref[...]

    n_pad = y.shape[-1]
    # 1-row lane masks; broadcast inside the selects (no (tb, n_pad) iota).
    lane = lax.broadcasted_iota(jnp.int32, (1, n_pad), 1)
    is_mu = lane < n_mu
    is_sigma = jnp.logical_and(lane >= n_mu, lane < 2 * n_mu)
    is_alpha = jnp.logical_and(lane >= 2 * n_mu, lane < 2 * n_mu + n_alpha)

    # One full-width exp for both sigma and (shifted) alpha lanes.
    a_max = jnp.max(jnp.where(is_alpha, y, -1e30), axis=-1, keepdims=True)
    z = jnp.where(is_alpha, y - a_max, y)
    ez = jnp.exp(z)

    sig = jnp.maximum(ez, 1e-6)                      # sigma lanes: z == y there
    e = jnp.where(is_alpha, ez, 0.0)                 # select, not multiply-mask
    denom = jnp.sum(e, axis=-1, keepdims=True)
    alpha = e / denom                                # exact: sum(alpha) == 1

    out = jnp.where(is_mu, y, jnp.where(is_sigma, sig, alpha))
    out_ref[...] = out.astype(out_ref.dtype)


def fuse_mdn_params(w_mu, b_mu, w_sigma, b_sigma, w_alpha, b_alpha):
    """Concat the three heads along the lane axis and pad to 128 lanes.

    Call ONCE at parameter-init time (not per forward call).
    Returns (w_cat, b_cat, n_mu, n_alpha).
    """
    n_mu = w_mu.shape[1]
    n_alpha = w_alpha.shape[1]
    n_total = 2 * n_mu + n_alpha
    n_pad = _round_up(n_total, _LANES)

    w_cat = jnp.concatenate([w_mu, w_sigma, w_alpha], axis=1)
    w_cat = jnp.pad(w_cat, ((0, 0), (0, n_pad - n_total)))
    b_cat = jnp.concatenate([b_mu, b_sigma, b_alpha], axis=0)
    b_cat = jnp.pad(b_cat, (0, n_pad - n_total)).reshape(1, n_pad)
    return w_cat, b_cat, n_mu, n_alpha


@functools.partial(jax.jit, static_argnames=("n_mu", "n_alpha", "block_cap"))
def mdn_forward_fused(x, w_cat, b_cat, *, n_mu, n_alpha, block_cap=4096):
    """x: (B, in_dim); w_cat: (in_dim, n_pad); b_cat: (1, n_pad).

    Returns (mu:(B,n_mu), sigma:(B,n_mu), alpha:(B,n_alpha)).
    """
    B, in_dim = x.shape
    n_pad = w_cat.shape[1]

    # Generation-aware batch tile: one grid step per TensorCore (1 on v5e/v6e,
    # exactly 2 on v7x for dual-TC occupancy), capped so double-buffered
    # x / out tiles stay far below the scoped VMEM limit on every chip.
    n_tc = _num_tensorcores()
    tb = _round_up(max(1, pl.cdiv(B, n_tc)), _SUBLANES)
    tb = max(_SUBLANES, min(tb, block_cap))
    grid = (pl.cdiv(B, tb),)

    rows = grid[0] * tb
    itemsize = jnp.dtype(x.dtype).itemsize
    cost = pl.CostEstimate(
        flops=2 * rows * in_dim * n_pad,
        transcendentals=rows * n_pad,                       # single fused exp
        bytes_accessed=itemsize * (rows * in_dim + rows * n_pad)
        + 4 * (in_dim * n_pad + n_pad),
    )

    kernel = functools.partial(_mdn_fused_kernel, n_mu=n_mu, n_alpha=n_alpha)
    out = pl.pallas_call(
        kernel,
        out_shape=jax.ShapeDtypeStruct((B, n_pad), x.dtype),
        grid_spec=pltpu.PrefetchScalarGridSpec(
            num_scalar_prefetch=0,
            grid=grid,
            in_specs=[
                # x tile (no wrapper-side pad; Pallas handles the ragged edge)
                pl.BlockSpec((tb, in_dim), lambda i: (i, 0)),
                # fused weights / bias stay resident (constant index_map)
                pl.BlockSpec((in_dim, n_pad), lambda i: (0, 0)),
                pl.BlockSpec((1, n_pad), lambda i: (0, 0)),
            ],
            out_specs=pl.BlockSpec((tb, n_pad), lambda i: (i, 0)),
        ),
        compiler_params=pltpu.CompilerParams(
            dimension_semantics=("parallel",),
        ),
        cost_estimate=cost,
    )(x, w_cat, b_cat)

    mu = out[:, :n_mu]
    sigma = out[:, n_mu:2 * n_mu]
    alpha = out[:, 2 * n_mu:2 * n_mu + n_alpha]
    return mu, sigma, alpha


def mdn_reference(x, w_mu, b_mu, w_sigma, b_sigma, w_alpha, b_alpha):
    mu = x @ w_mu + b_mu
    sigma = jnp.maximum(jnp.exp(x @ w_sigma + b_sigma), 1e-6)
    alpha = jax.nn.softmax(x @ w_alpha + b_alpha, axis=-1)
    return mu, sigma, alpha


if __name__ == "__main__":
    in_dim, out_dim, num_mixtures = 32, 4, 4   # hidden_dim=32 pooled features
    n_mu_dim = num_mixtures * out_dim

    key = jax.random.PRNGKey(0)
    k1, k2, k3, k4, k5, k6, kx = jax.random.split(key, 7)
    bound = 1.0 / jnp.sqrt(in_dim)             # nn.Linear default init range

    w_mu = jax.random.uniform(k1, (in_dim, n_mu_dim), minval=-bound,
                              maxval=bound, dtype=jnp.float32)
    b_mu = jax.random.uniform(k2, (n_mu_dim,), minval=-bound, maxval=bound,
                              dtype=jnp.float32)
    w_sigma = jax.random.uniform(k3, (in_dim, n_mu_dim), minval=-bound,
                                 maxval=bound, dtype=jnp.float32)
    b_sigma = jax.random.uniform(k4, (n_mu_dim,), minval=-bound, maxval=bound,
                                 dtype=jnp.float32)
    w_alpha = jax.random.uniform(k5, (in_dim, num_mixtures), minval=-bound,
                                 maxval=bound, dtype=jnp.float32)
    b_alpha = jax.random.uniform(k6, (num_mixtures,), minval=-bound,
                                 maxval=bound, dtype=jnp.float32)

    # Fuse + pad the head parameters ONCE (parameter-init time, not per call).
    w_cat, b_cat, n_mu, n_alpha = fuse_mdn_params(
        w_mu, b_mu, w_sigma, b_sigma, w_alpha, b_alpha)
    w_cat, b_cat = jax.block_until_ready((w_cat, b_cat))

    # Small canonical case (B=8), a ragged batch (B=13, exercises the partial
    # edge block), and a large batch (B=1024, exercises tile sizing).
    for B in (8, 13, 1024):
        kx, kb = jax.random.split(kx)
        x = jax.random.normal(kb, (B, in_dim), dtype=jnp.float32)

        mu, sigma, alpha = jax.block_until_ready(
            mdn_forward_fused(x, w_cat, b_cat, n_mu=n_mu, n_alpha=n_alpha))
        mu_r, sigma_r, alpha_r = mdn_reference(
            x, w_mu, b_mu, w_sigma, b_sigma, w_alpha, b_alpha)

        assert mu.shape == (B, n_mu_dim)
        assert sigma.shape == (B, n_mu_dim)
        assert alpha.shape == (B, num_mixtures)
        assert jnp.allclose(mu, mu_r, atol=1e-5, rtol=1e-5)
        assert jnp.allclose(sigma, sigma_r, atol=1e-5, rtol=1e-5)
        assert jnp.allclose(alpha, alpha_r, atol=1e-4, rtol=1e-4)
        assert jnp.allclose(jnp.sum(alpha, axis=-1), 1.0, atol=1e-5)
        assert bool(jnp.all(sigma >= 1e-6))

    print("KERNEL_OK")
</pallas_src>

<mosaic_0001>
module attributes {stable_mosaic.version = 11 : i64} {
  func.func @_mdn_fused_kernel(%arg0: i32, %arg1: memref<8x32xf32, #tpu.memory_space<vmem>>, %arg2: memref<32x128xf32, #tpu.memory_space<vmem>>, %arg3: memref<1x128xf32, #tpu.memory_space<vmem>>, %arg4: memref<8x128xf32, #tpu.memory_space<vmem>>) attributes {dimension_semantics = [#tpu.dimension_semantics<parallel>], iteration_bounds = array<i64: 1>, scalar_prefetch = 0 : i64, scratch_operands = 0 : i64, tpu.core_type = #tpu.core_type<tc>, window_params = [{transform_indices = @transform_0, window_bounds = array<i64: 8, 32>}, {pipeline_mode = #tpu.pipeline_mode<synchronous>, transform_indices = @transform_1, window_bounds = array<i64: 32, 128>}, {pipeline_mode = #tpu.pipeline_mode<synchronous>, transform_indices = @transform_2, window_bounds = array<i64: 1, 128>}, {transform_indices = @transform_3, window_bounds = array<i64: 8, 128>}]} {
    %c0 = arith.constant 0 : index
    %c0_0 = arith.constant 0 : index
    %0 = vector.load %arg1[%c0, %c0_0] : memref<8x32xf32, #tpu.memory_space<vmem>>, vector<8x32xf32>
    %c0_1 = arith.constant 0 : index
    %c0_2 = arith.constant 0 : index
    %1 = vector.load %arg2[%c0_1, %c0_2] : memref<32x128xf32, #tpu.memory_space<vmem>>, vector<32x128xf32>
    %cst = arith.constant dense<0.000000e+00> : vector<8x128xf32>
    %2 = tpu.matmul %0, %1, %cst {dimension_numbers = #tpu.dot_dimension_numbers<[1], [0], [0], [1], [0, 0, 1, 1], [], []>} : vector<8x32xf32>, vector<32x128xf32>, vector<8x128xf32> -> vector<8x128xf32>
    %c0_3 = arith.constant 0 : index
    %c0_4 = arith.constant 0 : index
    %3 = vector.load %arg3[%c0_3, %c0_4] : memref<1x128xf32, #tpu.memory_space<vmem>>, vector<1x128xf32>
    %4 = vector.broadcast %3 : vector<1x128xf32> to vector<8x128xf32>
    %5 = arith.addf %2, %4 : vector<8x128xf32>
    %6 = tpu.iota {dimensions = array<i32: 1>} : vector<1x128xi32>
    %c16_i32 = arith.constant 16 : i32
    %7 = vector.broadcast %c16_i32 : i32 to vector<1x128xi32>
    %8 = arith.cmpi slt, %6, %7 : vector<1x128xi32>
    %c16_i32_5 = arith.constant 16 : i32
    %9 = vector.broadcast %c16_i32_5 : i32 to vector<1x128xi32>
    %10 = arith.cmpi sge, %6, %9 : vector<1x128xi32>
    %c32_i32 = arith.constant 32 : i32
    %11 = vector.broadcast %c32_i32 : i32 to vector<1x128xi32>
    %12 = arith.cmpi slt, %6, %11 : vector<1x128xi32>
    %13 = arith.andi %10, %12 : vector<1x128xi1>
    %c32_i32_6 = arith.constant 32 : i32
    %14 = vector.broadcast %c32_i32_6 : i32 to vector<1x128xi32>
    %15 = arith.cmpi sge, %6, %14 : vector<1x128xi32>
    %c36_i32 = arith.constant 36 : i32
    %16 = vector.broadcast %c36_i32 : i32 to vector<1x128xi32>
    %17 = arith.cmpi slt, %6, %16 : vector<1x128xi32>
    %18 = arith.andi %15, %17 : vector<1x128xi1>
    %cst_7 = arith.constant -1.000000e+30 : f32
    %19 = vector.shape_cast %18 : vector<1x128xi1> to vector<1x128xi1>
    %20 = vector.broadcast %19 : vector<1x128xi1> to vector<8x128xi1>
    %21 = vector.broadcast %cst_7 : f32 to vector<8x128xf32>
    %22 = arith.select %20, %5, %21 : vector<8x128xi1>, vector<8x128xf32>
    %cst_8 = arith.constant dense<0xFF800000> : vector<8xf32>
    %23 = vector.multi_reduction <maximumf>, %22, %cst_8 [1] : vector<8x128xf32> to vector<8xf32>
    %24 = vector.shape_cast %23 : vector<8xf32> to vector<8x1xf32>
    %25 = vector.broadcast %24 : vector<8x1xf32> to vector<8x128xf32>
    %26 = arith.subf %5, %25 : vector<8x128xf32>
    %27 = vector.shape_cast %18 : vector<1x128xi1> to vector<1x128xi1>
    %28 = vector.broadcast %27 : vector<1x128xi1> to vector<8x128xi1>
    %29 = arith.select %28, %26, %5 : vector<8x128xi1>, vector<8x128xf32>
    %30 = math.exp %29 : vector<8x128xf32>
    %cst_9 = arith.constant 9.99999997E-7 : f32
    %31 = vector.broadcast %cst_9 : f32 to vector<8x128xf32>
    %32 = arith.maximumf %30, %31 : vector<8x128xf32>
    %cst_10 = arith.constant 0.000000e+00 : f32
    %33 = vector.shape_cast %18 : vector<1x128xi1> to vector<1x128xi1>
    %34 = vector.broadcast %33 : vector<1x128xi1> to vector<8x128xi1>
    %35 = vector.broadcast %cst_10 : f32 to vector<8x128xf32>
    %36 = arith.select %34, %30, %35 : vector<8x128xi1>, vector<8x128xf32>
    %cst_11 = arith.constant dense<0.000000e+00> : vector<8xf32>
    %37 = vector.multi_reduction <add>, %36, %cst_11 [1] : vector<8x128xf32> to vector<8xf32>
    %38 = vector.shape_cast %37 : vector<8xf32> to vector<8x1xf32>
    %39 = vector.broadcast %38 : vector<8x1xf32> to vector<8x128xf32>
    %40 = arith.divf %36, %39 : vector<8x128xf32>
    %41 = vector.shape_cast %13 : vector<1x128xi1> to vector<1x128xi1>
    %42 = vector.broadcast %41 : vector<1x128xi1> to vector<8x128xi1>
    %43 = arith.select %42, %32, %40 : vector<8x128xi1>, vector<8x128xf32>
    %44 = vector.shape_cast %8 : vector<1x128xi1> to vector<1x128xi1>
    %45 = vector.broadcast %44 : vector<1x128xi1> to vector<8x128xi1>
    %46 = arith.select %45, %5, %43 : vector<8x128xi1>, vector<8x128xf32>
    %c0_12 = arith.constant 0 : index
    %c0_13 = arith.constant 0 : index
    %47 = vector.load %arg4[%c0_12, %c0_13] : memref<8x128xf32, #tpu.memory_space<vmem>>, vector<8x128xf32>
    tpu.vector_store %arg4[%c0_12, %c0_13], %46 {strides = array<i32>} : memref<8x128xf32, #tpu.memory_space<vmem>>, vector<8x128xf32>,
    return
  }
  func.func @transform_0(%arg0: i32) -> (i32, i32) {
    %c0_i32 = arith.constant 0 : i32
    %c0_i32_0 = arith.constant 0 : i32
    return %arg0, %c0_i32 : i32, i32
  }
  func.func @transform_1(%arg0: i32) -> (i32, i32) {
    %c0_i32 = arith.constant 0 : i32
    %c0_i32_0 = arith.constant 0 : i32
    %c0_i32_1 = arith.constant 0 : i32
    return %c0_i32, %c0_i32_0 : i32, i32
  }
  func.func @transform_2(%arg0: i32) -> (i32, i32) {
    %c0_i32 = arith.constant 0 : i32
    %c0_i32_0 = arith.constant 0 : i32
    %c0_i32_1 = arith.constant 0 : i32
    return %c0_i32, %c0_i32_0 : i32, i32
  }
  func.func @transform_3(%arg0: i32) -> (i32, i32) {
    %c0_i32 = arith.constant 0 : i32
    %c0_i32_0 = arith.constant 0 : i32
    return %arg0, %c0_i32 : i32, i32
  }
}

</mosaic_0001>

<bundles_post_ra>
// kernel: mdn_forward_fused.1
= control target key start
LH: loop header
LB: loop body
LE: loop exit
PB: predicated region body
PF: predicated region fallthrough
CT: control target
= control target key end

     0   :  { %8 = vsyncpa [#allocation3], 0  ;;  %s310_s0 = inlined_call_operand.hbm [shape: f32[8,32], index: 0, kind: input, shape index: {}]   ;;  %s311_s1 = inlined_call_operand.hbm [shape: f32[32,128], index: 1, kind: input, shape index: {}]   ;;  %s312_s2 = inlined_call_operand.vmem [shape: f32[1,128], index: 2, kind: input, shape index: {}]   ;;  %s313_s3 = inlined_call_operand.vmem [shape: f32[8,128], index: 3, kind: output, shape index: {}]  }
   0x1   :  { %9 = vsyncpa [#allocation5], 0  ;;  %s246_s12 = smov [#allocation2]   ;;  %s247_s14 = smov [#allocation4]  }
   0x2   :  { %s16_s13 = sshll.u32 %s246_s12, 4  ;;  %s25_s15 = sshll.u32 %s247_s14, 4  ;;  %s17_s13 = int_to_ptr.vmem [resolvable:$true] %s16_s13  ;;  %s273_s15 = int_to_ptr.vmem [resolvable:$true] %s25_s15 }
   0x3   :  { %s198_s18 = scalar_lea.hbm %s310_s0, 128 }
   0x4   :  { %p199_p0 = scmp.ne.s32.totalorder %s310_s0, %s198_s18  ;;  %p202_p1 = scmp.lt.u32.totalorder %s198_s18, %s310_s0 }
   0x6   :  { %p204_p2 = pnand %p202_p1, %p199_p0 }
   0x8   :  { %207 = shalt.err (!%p204_p2)
}
   0x9   :  { %s208_s23 = scalar_lea.vmem %s17_s13, 128  ;;  %p213_p4 = scmp.lt.s32.totalorder %s17_s13, %s17_s13 }
   0xa   :  { %p209_p3 = scmp.ne.s32.totalorder %s17_s13, %s208_s23  ;;  %p214_p5 = scmp.lt.s32.totalorder %s208_s23, %s208_s23 }
   0xc   :  { %p215_p6 = por %p214_p5, %p213_p4 }
   0xe   :  { %p216_p7 = pnand %p215_p6, %p209_p3 }
  0x10   :  { %219 = shalt.err (!%p216_p7)
}
  0x11   :  { %19 = dma.hbm_to_vmem [thread:$0]  %s310_s0, 128, %s17_s13, [#allocation3]  }
  0x12   :  { %s220_s28 = scalar_lea.hbm %s311_s1, 512 }
  0x13   :  { %p221_p8 = scmp.ne.s32.totalorder %s311_s1, %s220_s28  ;;  %p224_p9 = scmp.lt.u32.totalorder %s220_s28, %s311_s1 }
  0x15   :  { %p226_p10 = pnand %p224_p9, %p221_p8 }
  0x17   :  { %229 = shalt.err (!%p226_p10)
}
  0x18   :  { %s230_s6 = scalar_lea.vmem %s273_s15, 512  ;;  %p235_p12 = scmp.lt.s32.totalorder %s273_s15, %s273_s15 }
  0x19   :  { %p231_p11 = scmp.ne.s32.totalorder %s273_s15, %s230_s6  ;;  %p236_p13 = scmp.lt.s32.totalorder %s230_s6, %s230_s6 }
  0x1b   :  { %p237_p0 = por %p236_p13, %p235_p12 }
  0x1d   :  { %p238_p1 = pnand %p237_p0, %p231_p11 }
  0x1f   :  { %241 = shalt.err (!%p238_p1)
}
  0x20   :  { %s248_s0 = smov 128   ;;  %s249_s7 = smov 8  }
  0x21   :  { %31 = dma.hbm_to_vmem [thread:$0]  %s311_s1, 512, %s273_s15, [#allocation5], %s248_s0, %s248_s0, %s249_s7  }
  0x22   :  { %242 = dma.done.wait [#allocation3], 128  }
  0x23   :  { %243 = vsyncadd [#allocation3], 4294967168 }
  0x24   :  { %244 = dma.done.wait [#allocation5], 512  }
  0x25   :  { %245 = vsyncadd [#allocation5], 4294966784  ;;  %v250_v0 = vmov 0.0|0.0   ;;  %vm251_vm0 = vmmov 0   ;;  %v252_v1 = vmov 0.0   ;;  %v41_v2 = vld [vmem:[#allocation4] sm:$0xff]  ;;  %v126_v9 = vlaneseq }
  0x26   :  { %181 = vmatprep.subr.bf16.mxu0 %v250_v0  ;;  %178 = vmatprep.mubr.msk.f32.mxu0 %vm251_vm0, %v252_v1  ;;  %v42_v3 = vld [vmem:[#allocation4 + $0x8] sm:$0xff]  ;;  %v43_v4 = vld [vmem:[#allocation4 + $0x10] sm:$0xff]  ;;  %v44_v6 = vld [vmem:[#allocation4 + $0x18] sm:$0xff]  ;;  %vm52_vm1 = vcmask 261120  }
  0x27   :  { %v182_v5 = vpack.c.bf16 %v42_v3, %v41_v2  ;;  %v185_v7 = vpack.c.bf16 %v44_v6, %v43_v4  ;;  %v40_v8 = vld [vmem:[#allocation2] sm:$0xff]  ;;  %v127_v10 = vand.u32 127, %v126_v9  ;;  %v163_v11 = vld [vmem:[%s312_s2] ss:$0 sm:$0xff] }
  0x29   :  { %183 = vmatpush3.bf16.msra.mxu0 %v182_v5  ;;  %vm132_vm2 = vcmp.ge.s32.totalorder %v127_v10, 32  ;;  %vm133_vm3 = vcmp.lt.s32.totalorder %v127_v10, 36  ;;  %vm129_vm5 = vcmp.ge.s32.totalorder %v127_v10, 16  ;;  %vm130_vm6 = vcmp.lt.s32.totalorder %v127_v10, 32 }
  0x2a   :  { %184 = vmatprep.subr.bf16.mxu0 %v250_v0  ;;  %vm134_vm4 = vmand %vm132_vm2, %vm133_vm3  ;;  %vm128_vm8 = vcmp.lt.s32.totalorder %v127_v10, 16 }
  0x2b   :  { %vm131_vm7 = vmand %vm129_vm5, %vm130_vm6 }
  0x2d   :  { %186 = vmatpush3.bf16.msra.mxu0 %v185_v7 }
  0x30   :  { %179 = vmatmul.mubr.msk.f32.vlgmr.msra.gmra.mrb[0].mxu0 %vm52_vm1, %v40_v8 }
 0x103   :  { %v122_v12 = vpop.f32.mrb[0].mxu0 }
 0x104   :  { %v123_v13 = vadd.f32 %v163_v11, %v122_v12  ;;  %v180_v14 = vpop.f32.mrb[1].mxu0 }
 0x106   :  { %v137_v15 = vsel %vm134_vm4, %v123_v13, -1e+30 }
 0x107   :  { %138 = vmax.xlane.f32.xlu0 %v137_v15 }
 0x194   :  { %v139_v16 = vpop.xlane.xlu0 %138 }
 0x195   :  { %v140_v17 = vsub.f32 %v123_v13, %v139_v16 }
 0x197   :  { %v141_v18 = vsel %vm134_vm4, %v140_v17, %v123_v13 }
 0x198   :  { %v142_v19 = vmul.f32 1.442695, %v141_v18 }
 0x19a   :  { %194 = vpow2.f32 %v142_v19 }
 0x1a4   :  { %v195_v20 = vpop.eup %194 }
 0x1a5   :  { %v145_v21 = vsel %vm134_vm4, %v195_v20, 0.0  ;;  %v144_v24 = vmax.f32 %v195_v20, 1e-06 }
 0x1a6   :  { %146 = vadd.xlane.f32.xlu0 %v145_v21 }
 0x233   :  { %v147_v22 = vpop.xlane.xlu0 %146 }
 0x234   :  { %196 = vrcp.f32 %v147_v22 }
 0x23e   :  { %v197_v23 = vpop.eup %196 }
 0x23f   :  { %v149_v25 = vmul.f32 %v197_v23, %v145_v21 }
 0x241   :  { %v152_v26 = vsel %vm131_vm7, %v144_v24, %v149_v25 }
 0x242   :  { %v155_v27 = vsel %vm128_vm8, %v123_v13, %v152_v26 }
 0x243   :  { %156 = vst [vmem:[%s313_s3] sm:$0xff] %v155_v27 }
 0x244   :  { %161 = vsyncpa [#allocation3], 1 }
 0x245   :  { %162 = vsyncpa [#allocation5], 1 }

</bundles_post_ra>
